<compile_context>
chip_gen: v7x
topology: tpu7x:2x2x1
jax: 0.10.0
libtpu: 0.0.40
codegen_flags: <defaults>
</compile_context>

<pallas_src>
import jax
import jax.numpy as jnp
from jax import lax
from jax.experimental import pallas as pl
from jax.experimental.pallas import tpu as pltpu

NUM_FEATS = 10                       # numeric features (x[:, :-3])
EMBS = (4, 3, 3)                     # embedding widths -> 10 + 4 + 3 + 3 = 20
CULT_N, SOIL_N, COVER_N = 7, 7, 8
TOTAL_ROWS = CULT_N + SOIL_N + COVER_N    # 22 rows in the folded table
IN_DIM = NUM_FEATS + sum(EMBS)            # 20 == "10 + 10" in the PyTorch module
OUT_DIM = 2
X_COLS = NUM_FEATS + 3                    # 13


def _round_up(v, m):
    return ((v + m - 1) // m) * m


def embedded_linear_odef_kernel(xt_ref, wn_t_ref, table_t_ref, o_ref):
    """One lane-dense batch tile: out[2, tb] = Wn'^T @ x_num + T_fold^T @ onehot."""
    xt = xt_ref[...]                                                  # [13, tb]
    x_num = xt[:NUM_FEATS, :]                                         # [10, tb]

    # Per-segment clamp (matches PyTorch for valid indices; prevents a dirty
    # index from aliasing into the next segment), then offset into the
    # combined 22-row folded table.  astype truncates toward zero (== .long()).
    i1 = jnp.clip(xt[NUM_FEATS + 0:NUM_FEATS + 1, :].astype(jnp.int32),
                  0, CULT_N - 1)                                       # [1, tb]
    i2 = jnp.clip(xt[NUM_FEATS + 1:NUM_FEATS + 2, :].astype(jnp.int32),
                  0, SOIL_N - 1) + CULT_N                              # [1, tb]
    i3 = jnp.clip(xt[NUM_FEATS + 2:NUM_FEATS + 3, :].astype(jnp.int32),
                  0, COVER_N - 1) + (CULT_N + SOIL_N)                  # [1, tb]

    iota = lax.broadcasted_iota(jnp.int32, (TOTAL_ROWS, x_num.shape[1]), 0)   # [22, tb]
    one_hot = ((iota == i1) | (iota == i2) | (iota == i3)).astype(jnp.float32)  # [22, tb]

    out = jnp.dot(wn_t_ref[...], x_num,
                  preferred_element_type=jnp.float32)                  # [2, tb]
    out = out + jnp.dot(table_t_ref[...], one_hot,
                        preferred_element_type=jnp.float32)            # [2, tb]
    o_ref[...] = out                                                   # bias already folded into table


def embedded_linear_odef(t, x, cult_w, soil_w, cover_w, mean, std, w, b,
                         *, block_b=4096):
    """Pallas wrapper. `t` is unused, matching the PyTorch forward signature."""
    del t
    B = x.shape[0]

    # ---- wrapper-time algebraic folds (constant-sized, done once per call) ----
    inv_std = 1.0 / std                                                # [10]
    wn_t = (w[:NUM_FEATS] * inv_std[:, None]).T                        # [2, 10]
    b_fold = b - (mean * inv_std) @ w[:NUM_FEATS]                      # [2]
    table = jnp.concatenate(
        [cult_w @ w[NUM_FEATS:NUM_FEATS + EMBS[0]],                    # [7, 2]
         soil_w @ w[NUM_FEATS + EMBS[0]:NUM_FEATS + EMBS[0] + EMBS[1]],  # [7, 2]
         # exactly one cover row is always selected -> fold the bias here
         cover_w @ w[NUM_FEATS + EMBS[0] + EMBS[1]:] + b_fold[None, :]],  # [8, 2]
        axis=0)                                                        # [22, 2]
    table_t = table.T                                                  # [2, 22]

    # ---- tile / grid selection ----
    # Large tiles amortize the ~0.35 us per-grid-step overhead; keep >= 2 grid
    # steps (when B allows) so v7x's two TensorCores both get work.
    if B <= 128:
        n_steps = 1
    else:
        n_steps = max(2, pl.cdiv(B, block_b))
    tb = _round_up(pl.cdiv(B, n_steps), 128)
    tb = min(tb, _round_up(block_b, 128))
    b_pad = _round_up(B, tb)
    n_steps = b_pad // tb

    # Lane-dense layout: batch on the 128-lane axis.
    x_t = jnp.transpose(x)                                             # [13, B]
    if b_pad != B:
        x_t = jnp.pad(x_t, ((0, 0), (0, b_pad - B)))                   # zero rows -> sliced off below

    out_t = pl.pallas_call(
        embedded_linear_odef_kernel,
        out_shape=jax.ShapeDtypeStruct((OUT_DIM, b_pad), jnp.float32),
        grid_spec=pltpu.PrefetchScalarGridSpec(
            num_scalar_prefetch=0,
            grid=(n_steps,),
            in_specs=[
                pl.BlockSpec((X_COLS, tb), lambda i: (0, i)),          # x^T tile (lane-dense)
                pl.BlockSpec((OUT_DIM, NUM_FEATS), lambda i: (0, 0)),  # Wn'^T (grid-invariant)
                pl.BlockSpec((OUT_DIM, TOTAL_ROWS), lambda i: (0, 0)),  # folded table^T (grid-invariant)
            ],
            out_specs=pl.BlockSpec((OUT_DIM, tb), lambda i: (0, i)),   # [2, tb] lane-dense
        ),
        compiler_params=pltpu.CompilerParams(
            dimension_semantics=("parallel",)),
    )(x_t, wn_t, table_t)

    return out_t[:, :B].T                                              # [B, 2]


def _reference(t, x, cult_w, soil_w, cover_w, mean, std, w, b):
    """Plain-JAX reference mirroring the PyTorch forward (unfolded)."""
    del t
    i1 = x[:, -3].astype(jnp.int32)
    i2 = x[:, -2].astype(jnp.int32)
    i3 = x[:, -1].astype(jnp.int32)
    xn = (x[:, :-3] - mean) / std
    feats = jnp.concatenate([xn, cult_w[i1], soil_w[i2], cover_w[i3]], axis=-1)
    return feats @ w + b


if __name__ == "__main__":
    key = jax.random.PRNGKey(0)
    k_x, k_i1, k_i2, k_i3, k_c, k_s, k_v, k_w, k_b = jax.random.split(key, 9)

    B = 300   # ragged batch: exercises padding + a 2-step grid (tb = 256)
    x_num = jax.random.normal(k_x, (B, NUM_FEATS), dtype=jnp.float32)
    idx1 = jax.random.randint(k_i1, (B, 1), 0, CULT_N).astype(jnp.float32)
    idx2 = jax.random.randint(k_i2, (B, 1), 0, SOIL_N).astype(jnp.float32)
    idx3 = jax.random.randint(k_i3, (B, 1), 0, COVER_N).astype(jnp.float32)
    x = jnp.concatenate([x_num, idx1, idx2, idx3], axis=-1)            # [B, 13]

    # deterministic synthetic parameters (no checkpoint load)
    cult_w = jax.random.normal(k_c, (CULT_N, EMBS[0]), dtype=jnp.float32) * 0.1
    soil_w = jax.random.normal(k_s, (SOIL_N, EMBS[1]), dtype=jnp.float32) * 0.1
    cover_w = jax.random.normal(k_v, (COVER_N, EMBS[2]), dtype=jnp.float32) * 0.1
    mean = jnp.linspace(-0.5, 0.5, NUM_FEATS).astype(jnp.float32)
    std = jnp.linspace(0.5, 1.5, NUM_FEATS).astype(jnp.float32)
    w = jax.random.normal(k_w, (IN_DIM, OUT_DIM), dtype=jnp.float32) * 0.1
    b = jax.random.normal(k_b, (OUT_DIM,), dtype=jnp.float32) * 0.1

    t = jnp.zeros((), jnp.float32)  # unused, kept for signature parity

    out = embedded_linear_odef(t, x, cult_w, soil_w, cover_w, mean, std, w, b)
    out = jax.block_until_ready(out)

    ref = _reference(t, x, cult_w, soil_w, cover_w, mean, std, w, b)
    ref = jax.block_until_ready(ref)

    assert out.shape == (B, OUT_DIM)
    import numpy as np
    np.testing.assert_allclose(np.asarray(out), np.asarray(ref),
                               rtol=1e-4, atol=1e-5)
    print("KERNEL_OK")
</pallas_src>

<mosaic_0001>
module attributes {stable_mosaic.version = 11 : i64} {
  func.func @embedded_linear_odef_kernel(%arg0: i32, %arg1: memref<13x256xf32, #tpu.memory_space<vmem>>, %arg2: memref<2x10xf32, #tpu.memory_space<vmem>>, %arg3: memref<2x22xf32, #tpu.memory_space<vmem>>, %arg4: memref<2x256xf32, #tpu.memory_space<vmem>>) attributes {dimension_semantics = [#tpu.dimension_semantics<parallel>], iteration_bounds = array<i64: 2>, scalar_prefetch = 0 : i64, scratch_operands = 0 : i64, tpu.core_type = #tpu.core_type<tc>, window_params = [{transform_indices = @transform_0, window_bounds = array<i64: 13, 256>}, {pipeline_mode = #tpu.pipeline_mode<synchronous>, transform_indices = @transform_1, window_bounds = array<i64: 2, 10>}, {pipeline_mode = #tpu.pipeline_mode<synchronous>, transform_indices = @transform_2, window_bounds = array<i64: 2, 22>}, {transform_indices = @transform_3, window_bounds = array<i64: 2, 256>}]} {
    %c0 = arith.constant 0 : index
    %c0_0 = arith.constant 0 : index
    %0 = vector.load %arg1[%c0, %c0_0] : memref<13x256xf32, #tpu.memory_space<vmem>>, vector<13x256xf32>
    %1 = vector.extract_strided_slice %0 {offsets = [0, 0], sizes = [10, 256], strides = [1, 1]} : vector<13x256xf32> to vector<10x256xf32>
    %2 = vector.extract_strided_slice %0 {offsets = [10, 0], sizes = [1, 256], strides = [1, 1]} : vector<13x256xf32> to vector<1x256xf32>
    %3 = arith.fptosi %2 : vector<1x256xf32> to vector<1x256xi32>
    %c0_i32 = arith.constant 0 : i32
    %c6_i32 = arith.constant 6 : i32
    %4 = vector.broadcast %c0_i32 : i32 to vector<1x256xi32>
    %5 = arith.maxsi %4, %3 : vector<1x256xi32>
    %6 = vector.broadcast %c6_i32 : i32 to vector<1x256xi32>
    %7 = arith.minsi %6, %5 : vector<1x256xi32>
    %8 = vector.extract_strided_slice %0 {offsets = [11, 0], sizes = [1, 256], strides = [1, 1]} : vector<13x256xf32> to vector<1x256xf32>
    %9 = arith.fptosi %8 : vector<1x256xf32> to vector<1x256xi32>
    %c0_i32_1 = arith.constant 0 : i32
    %c6_i32_2 = arith.constant 6 : i32
    %10 = vector.broadcast %c0_i32_1 : i32 to vector<1x256xi32>
    %11 = arith.maxsi %10, %9 : vector<1x256xi32>
    %12 = vector.broadcast %c6_i32_2 : i32 to vector<1x256xi32>
    %13 = arith.minsi %12, %11 : vector<1x256xi32>
    %c7_i32 = arith.constant 7 : i32
    %14 = vector.broadcast %c7_i32 : i32 to vector<1x256xi32>
    %15 = arith.addi %13, %14 : vector<1x256xi32>
    %16 = vector.extract_strided_slice %0 {offsets = [12, 0], sizes = [1, 256], strides = [1, 1]} : vector<13x256xf32> to vector<1x256xf32>
    %17 = arith.fptosi %16 : vector<1x256xf32> to vector<1x256xi32>
    %c0_i32_3 = arith.constant 0 : i32
    %c7_i32_4 = arith.constant 7 : i32
    %18 = vector.broadcast %c0_i32_3 : i32 to vector<1x256xi32>
    %19 = arith.maxsi %18, %17 : vector<1x256xi32>
    %20 = vector.broadcast %c7_i32_4 : i32 to vector<1x256xi32>
    %21 = arith.minsi %20, %19 : vector<1x256xi32>
    %c14_i32 = arith.constant 14 : i32
    %22 = vector.broadcast %c14_i32 : i32 to vector<1x256xi32>
    %23 = arith.addi %21, %22 : vector<1x256xi32>
    %24 = tpu.iota {dimensions = array<i32: 0>} : vector<22x256xi32>
    %25 = vector.broadcast %7 : vector<1x256xi32> to vector<22x256xi32>
    %26 = arith.cmpi eq, %24, %25 : vector<22x256xi32>
    %27 = vector.broadcast %15 : vector<1x256xi32> to vector<22x256xi32>
    %28 = arith.cmpi eq, %24, %27 : vector<22x256xi32>
    %29 = arith.ori %26, %28 : vector<22x256xi1>
    %30 = vector.broadcast %23 : vector<1x256xi32> to vector<22x256xi32>
    %31 = arith.cmpi eq, %24, %30 : vector<22x256xi32>
    %32 = arith.ori %29, %31 : vector<22x256xi1>
    %33 = arith.extui %32 : vector<22x256xi1> to vector<22x256xi32>
    %34 = arith.sitofp %33 : vector<22x256xi32> to vector<22x256xf32>
    %c0_5 = arith.constant 0 : index
    %c0_6 = arith.constant 0 : index
    %35 = vector.load %arg2[%c0_5, %c0_6] : memref<2x10xf32, #tpu.memory_space<vmem>>, vector<2x10xf32>
    %cst = arith.constant dense<0.000000e+00> : vector<2x256xf32>
    %36 = tpu.matmul %35, %1, %cst {dimension_numbers = #tpu.dot_dimension_numbers<[1], [0], [0], [1], [0, 0, 1, 1], [], []>} : vector<2x10xf32>, vector<10x256xf32>, vector<2x256xf32> -> vector<2x256xf32>
    %c0_7 = arith.constant 0 : index
    %c0_8 = arith.constant 0 : index
    %37 = vector.load %arg3[%c0_7, %c0_8] : memref<2x22xf32, #tpu.memory_space<vmem>>, vector<2x22xf32>
    %cst_9 = arith.constant dense<0.000000e+00> : vector<2x256xf32>
    %38 = tpu.matmul %37, %34, %cst_9 {dimension_numbers = #tpu.dot_dimension_numbers<[1], [0], [0], [1], [0, 0, 1, 1], [], []>} : vector<2x22xf32>, vector<22x256xf32>, vector<2x256xf32> -> vector<2x256xf32>
    %39 = arith.addf %36, %38 : vector<2x256xf32>
    %c0_10 = arith.constant 0 : index
    %c0_11 = arith.constant 0 : index
    %40 = vector.load %arg4[%c0_10, %c0_11] : memref<2x256xf32, #tpu.memory_space<vmem>>, vector<2x256xf32>
    tpu.vector_store %arg4[%c0_10, %c0_11], %39 {strides = array<i32>} : memref<2x256xf32, #tpu.memory_space<vmem>>, vector<2x256xf32>,
    return
  }
  func.func @transform_0(%arg0: i32) -> (i32, i32) {
    %c0_i32 = arith.constant 0 : i32
    %c0_i32_0 = arith.constant 0 : i32
    return %c0_i32, %arg0 : i32, i32
  }
  func.func @transform_1(%arg0: i32) -> (i32, i32) {
    %c0_i32 = arith.constant 0 : i32
    %c0_i32_0 = arith.constant 0 : i32
    %c0_i32_1 = arith.constant 0 : i32
    return %c0_i32, %c0_i32_0 : i32, i32
  }
  func.func @transform_2(%arg0: i32) -> (i32, i32) {
    %c0_i32 = arith.constant 0 : i32
    %c0_i32_0 = arith.constant 0 : i32
    %c0_i32_1 = arith.constant 0 : i32
    return %c0_i32, %c0_i32_0 : i32, i32
  }
  func.func @transform_3(%arg0: i32) -> (i32, i32) {
    %c0_i32 = arith.constant 0 : i32
    %c0_i32_0 = arith.constant 0 : i32
    return %c0_i32, %arg0 : i32, i32
  }
}

</mosaic_0001>

<bundles_post_ra>
// kernel: tpu_custom_call.1
= control target key start
LH: loop header
LB: loop body
LE: loop exit
PB: predicated region body
PF: predicated region fallthrough
CT: control target
= control target key end

     0   :  { %8 = vsyncpa [#allocation3], 0  ;;  %s946_s0 = inlined_call_operand.hbm [shape: f32[13,512], index: 0, kind: input, shape index: {}]   ;;  %s947_s1 = inlined_call_operand.vmem [shape: f32[2,10], index: 1, kind: input, shape index: {}]   ;;  %s948_s2 = inlined_call_operand.vmem [shape: f32[2,22], index: 2, kind: input, shape index: {}]   ;;  %s949_s3 = inlined_call_operand.hbm [shape: f32[2,512], index: 3, kind: output, shape index: {}]  }
   0x1   :  { %10 = vsyncpa [#allocation3 + $0x1], 0 }
   0x2   :  { %11 = vsyncpa [#allocation4], 0 }
   0x3   :  { %13 = vsyncpa [#allocation4 + $0x1], 0  ;;  %s773_s12 = smov 0   ;;  %s775_s13 = smov 0  }
   0x4   :  { %s777_s14 = smov 0   ;;  %s779_s15 = smov 0  }
   0x5 LB: > { %s794_s16 = sadd.s32 4294967295, %s743_s15   ;;  %s546_s17 = sadd.s32 4294967294, %s743_s15   ;;  %s743_s15 = sphi %s779_s15, %s963_s15   ;;  %s739_s14 = sphi %s777_s14, %s962_s14   ;;  %s735_s13 = sphi %s775_s13, %s961_s13   ;;  %s731_s12 = sphi %s773_s12, %s960_s12  }
   0x6   : > { %s798_s18 = sadd.s32 1, %s743_s15   ;;  %s26_s19 = sadd.s32 1, %s739_s14 }
   0x7   : > { %s23_s20 = ssub.s32 %s743_s15, %s798_s18  ;;  %p33_p0 = scmp.ne.s32.totalorder %s739_s14, %s735_s13 }
   0x8   : > { %p24_p1 = scmp.eq.s32.totalorder %s23_s20, 0  ;;  %p34_p2 = scmp.eq.s32.totalorder %s743_s15, 0 }
   0x9   : > { %p39_p3 = scmp.ne.s32.totalorder %s735_s13, %s731_s12  ;;  %p40_p4 = scmp.eq.s32.totalorder %s794_s16, 0 }
   0xa   : > { %s810_s21 = scalar_select %p24_p1, %s739_s14, %s26_s19  }
   0xb   : > { %p812_p5 = por %p34_p2, %p33_p0  ;;  %p816_p6 = por %p40_p4, %p39_p3 }
   0xc   : > { %p105_p7 = scmp.eq.s32.totalorder %s794_s16, 1  ;;  %p111_p8 = scmp.eq.s32.totalorder %s546_s17, 1 }
   0xd   : > { %p607_p10 = scmp.lt.s32.totalorder %s743_s15, 2  ;;  %s137_s26 = sand.u32 1, %s739_s14  }
   0xe   : > { %p823_p11 = por %p105_p7, %p33_p0  ;;  %p827_p12 = por %p111_p8, %p39_p3 }
   0xf   : > { %s577_s27 = sshll.u32 %s743_s15, 8  ;;  %s549_s28 = sshll.u32 %s137_s26, 5 }
  0x10   : > { %s953_s24 = scalar_select %p823_p11, 1, 0 }
  0x11   : > { %s954_s25 = scalar_select %p827_p12, 1, 0 }
  0x12   : > { %s836_s4 = scalar_lea.hbm %s946_s0, %s577_s27  ;;  %s141_s5 = scalar_lea.vmem [#allocation2], %s549_s28 }
  0x13   : > { %s148_s6 = sshll.u32 %s141_s5, 4  ;;  %p840_p13 = pnand %p607_p10, %p812_p5  ;;  %s844_s6 = int_to_ptr.vmem [resolvable:$true] %s148_s6 }
  0x14   : > { %s847_s8 = scalar_lea.sflag [#allocation3], %s137_s26  ;;  %s647_s9 = scalar_lea.hbm %s836_s4, 512 }
  0x15   : > { %p648_p1 = scmp.ne.s32.totalorder %s836_s4, %s647_s9  ;;  %p649_p2 = pneg %p840_p13 }
  0x16   : > { %s652_s17 = scalar_lea.hbm %s946_s0, 1024  ;;  %p653_p5 = scmp.lt.u32.totalorder %s836_s4, %s946_s0 }
  0x17   : > { %p650_p3 = pnand %p649_p2, %p648_p1  ;;  %p654_p7 = scmp.lt.u32.totalorder %s652_s17, %s647_s9 }
  0x18   : > { %p656_p10 = scmp.lt.u32.totalorder %s647_s9, %s836_s4 }
  0x19   : > { %p651_p4 = pneg %p650_p3  ;;  %p655_p8 = por %p654_p7, %p653_p5 }
  0x1b   : > { %p657_p9 = por %p656_p10, %p655_p8 }
  0x1d   : > { %p658_p0 = pnand %p657_p9, %p651_p4 }
  0x1f   : > { %661 = shalt.err (!%p658_p0)
}
  0x20   : > { %s662_s22 = scalar_lea.vmem %s844_s6, 512  ;;  %s745_s26 = smov [#allocation2]  }
  0x21   : > { %p663_p1 = scmp.ne.s32.totalorder %s844_s6, %s662_s22  ;;  %s667_s27 = sshll.u32 %s745_s26, 4  ;;  %s668_s27 = int_to_ptr.vmem [resolvable:$false] %s667_s27 }
  0x22   : > { %s669_s28 = scalar_lea.vmem %s668_s27, 1024  ;;  %p670_p11 = scmp.lt.s32.totalorder %s844_s6, %s668_s27 }
  0x23   : > { %p665_p3 = pnand %p663_p1, %p649_p2  ;;  %p671_p5 = scmp.lt.s32.totalorder %s669_s28, %s662_s22 }
  0x25   : > { %p666_p12 = pneg %p665_p3  ;;  %p672_p7 = por %p671_p5, %p670_p11 }
  0x27   : > { %p673_p8 = pnand %p672_p7, %p666_p12 }
  0x29   : > { %676 = shalt.err (!%p673_p8)
}
  0x2a   : > { %s746_s29 = smov 512   ;;  %s747_s30 = smov 256  }
  0x2b   : > { %s748_s5 = smov 16   ;;  %p156_p9 = scmp.lt.s32.totalorder %s743_s15, 3 }
  0x2c   : > { %602 = dma.hbm_to_vmem [thread:$0]  (!%p840_p13), %s836_s4, 512, %s844_s6, %s847_s8, %s746_s29, %s747_s30, %s748_s5  }
  0x2d   : > { %p956_p0 = scmp.ge.s32.totalorder %s743_s15, 1 }
  0x2f   : > { %p157_p2 = pnand %p956_p0, %p156_p9 }
  0x30   : > { %s879_s9 = sand.u32 (!%p157_p2), 1, %s735_s13  }
  0x31   : > { %160 = sbr.rel (%p157_p2) target bundleno = 318 (0x13e), region = 32  ;;  %s553_s10 = sshll.u32 (!%p157_p2), %s879_s9, 5 }
  0x32   : > { %s163_s11 = scalar_lea.sflag (!%p157_p2), [#allocation3], %s879_s9  ;;  %s166_s17 = scalar_lea.vmem (!%p157_p2), [#allocation2], %s553_s10 }
  0x38   : > { %722 = dma.done.wait (%p816_p6), %s163_s11, 512  }
  0x39   : > { %724 = vsyncadd (%p816_p6), %s163_s11, 4294966784  ;;  %v749_v0 = vmov 0.0   ;;  %vm371_vm0 = vcmask 1041408   ;;  %v213_v1 = vlaneseq  ;;  %vm750_vm1 = vmmov 1   ;;  %v194_v2 = vld [vmem:[%s166_s17 + $0x18] sm:$0x1f] }
  0x3a   : > { %442 = vmatprep.mubr.f32.mxu0 %v749_v0  ;;  %360 = vmatprep.mubr.f32.mxu1 %v749_v0  ;;  %vm584_vm2 = vmpackc.low %vm371_vm0, %vm750_vm1  ;;  %v193_v3 = vld [vmem:[%s166_s17 + $0x10] sm:$0x1f]  ;;  %v192_v4 = vld [vmem:[%s166_s17 + $0x8] sm:$0xff]  ;;  %v593_v5 = vtrunc.f32 %v194_v2  ;;  %vm367_vm3 = vcmask 80896   ;;  %v751_v35 = vmov 1.0|1.0  }
  0x3b   : > { %v214_v6 = vshrl.u32 %v213_v1, 7  ;;  %v591_v7 = vtrunc.f32 %v193_v3  ;;  %v583_v8 = vpack.c.bf16 %v194_v2, %v192_v4  ;;  %v191_v9 = vld [vmem:[%s166_s17] sm:$0xff]  ;;  %s554_s8 = sshll.u32 %s879_s9, 2  ;;  %s578_s19 = sshll.u32 %s794_s16, 6 }
  0x3c   : > { %v586_v10 = vpack.c.bf16 %v193_v3, %v191_v9  ;;  %v594_v11 = vcvt.f32.s32 %v593_v5  ;;  %v283_v13 = vld [vmem:[%s947_s1] sm:$0x3]  ;;  %s188_s20 = scalar_lea.vmem [#allocation5], %s554_s8  ;;  %s902_s28 = scalar_lea.hbm %s949_s3, %s578_s19 }
  0x3d   : > { %v592_v12 = vcvt.f32.s32 %v591_v7  ;;  %585 = vmatprep.subr.msk.bf16.mxu0 %vm584_vm2, %v583_v8  ;;  %v215_v14 = vadd.s32 8, %v214_v6  ;;  %v219_v15 = vsub.s32 2, %v214_v6  ;;  %v233_v17 = vsub.s32 3, %v214_v6  ;;  %v284_v37 = vld [vmem:[%s948_s2] sm:$0x3]  ;;  %s476_s22 = sshll.u32 %s188_s20, 4  ;;  %s904_s22 = int_to_ptr.vmem [resolvable:$true] %s476_s22 }
  0x3e   : > { %588 = vmatpush1.bf16.msk.msra.mxu0 %vm584_vm2, %v586_v10  ;;  %vm199_vm4 = vcmp.gt.s32.totalorder %v594_v11, 0  ;;  %v253_v18 = vsub.s32 4, %v214_v6  ;;  %v216_v34 = vadd.s32 16, %v214_v6  ;;  %s462_s29 = scalar_lea.sflag [#allocation4], %s879_s9  ;;  %s677_s30 = scalar_lea.vmem %s904_s22, 64 }
  0x3f   : > { %vm197_vm5 = vcmp.gt.s32.totalorder %v592_v12, 0  ;;  %v200_v16 = vsel %vm199_vm4, %v594_v11, 0  ;;  %p678_p6 = scmp.ne.s32.totalorder %s904_s22, %s677_s30  ;;  %p957_p11 = scmp.ne.s32.totalorder %s953_s24, 0 }
  0x40   : > { %v198_v19 = vsel %vm197_vm5, %v592_v12, 0  ;;  %vm203_vm6 = vcmp.lt.s32.totalorder %v200_v16, 6  ;;  %vm209_vm7 = vcmp.lt.s32.totalorder %v200_v16, 7  ;;  %s752_s16 = smov [#allocation5]  }
  0x41   : > { %vm201_vm8 = vcmp.lt.s32.totalorder %v198_v19, 6  ;;  %vm207_vm9 = vcmp.lt.s32.totalorder %v198_v19, 7  ;;  %570 = vmatmul.mubr.msk.f32.vlgmr.msra.gmra.mrb[0].mxu0 %vm367_vm3, %v283_v13  ;;  %v204_v20 = vsel %vm203_vm6, %v200_v16, 6  ;;  %v210_v21 = vsel %vm209_vm7, %v200_v16, 7  ;;  %p679_p12 = pnand %p678_p6, %p957_p11  ;;  %s681_s5 = sshll.u32 %s752_s16, 4  ;;  %s682_s5 = int_to_ptr.vmem [resolvable:$false] %s681_s5 }
  0x42   : > { %v202_v22 = vsel %vm201_vm8, %v198_v19, 6  ;;  %v208_v23 = vsel %vm207_vm9, %v198_v19, 7  ;;  %v206_v24 = vadd.s32 7, %v204_v20  ;;  %v212_v25 = vadd.s32 14, %v210_v21  ;;  %s683_s10 = scalar_lea.vmem %s682_s5, 128  ;;  %p684_p4 = scmp.lt.s32.totalorder %s904_s22, %s682_s5 }
  0x43   : > { %v224_v26 = vrot.slane %v204_v20, %v219_v15  ;;  %v205_v27 = vadd.s32 7, %v202_v22  ;;  %v211_v28 = vadd.s32 14, %v208_v23  ;;  %v220_v31 = vrot.slane %v202_v22, %v219_v15  ;;  %p680_p13 = pneg %p679_p12  ;;  %p685_p10 = scmp.lt.s32.totalorder %s683_s10, %s677_s30 }
  0x44   : > { %v238_v29 = vrot.slane %v206_v24, %v233_v17  ;;  %v258_v30 = vrot.slane %v212_v25, %v253_v18 }
  0x45   : > { %vm226_vm10 = vcmp.eq.s32.totalorder %v214_v6, %v224_v26  ;;  %vm228_vm11 = vcmp.eq.s32.totalorder %v215_v14, %v224_v26  ;;  %v234_v32 = vrot.slane %v205_v27, %v233_v17  ;;  %v254_v33 = vrot.slane %v211_v28, %v253_v18  ;;  %p686_p1 = por %p685_p10, %p684_p4 }
  0x46   : > { %vm240_vm12 = vcmp.eq.s32.totalorder %v214_v6, %v238_v29  ;;  %vm242_vm13 = vcmp.eq.s32.totalorder %v215_v14, %v238_v29  ;;  %vm260_vm14 = vcmp.eq.s32.totalorder %v214_v6, %v258_v30  ;;  %vm262_vm0 = vcmp.eq.s32.totalorder %v215_v14, %v258_v30 }
  0x47   : > { %vm246_vm15 = vmor %vm226_vm10, %vm240_vm12  ;;  %vm225_vm3 = vcmp.eq.s32.totalorder %v214_v6, %v220_v31  ;;  %vm239_vm4 = vcmp.eq.s32.totalorder %v214_v6, %v234_v32  ;;  %vm227_vm6 = vcmp.eq.s32.totalorder %v215_v14, %v220_v31  ;;  %vm241_vm7 = vcmp.eq.s32.totalorder %v215_v14, %v234_v32  ;;  %p687_p3 = pnand %p686_p1, %p680_p13 }
  0x48   : > { %vm248_vm1 = vmor %vm228_vm11, %vm242_vm13  ;;  %vm259_vm9 = vcmp.eq.s32.totalorder %v214_v6, %v254_v33  ;;  %vm261_vm12 = vcmp.eq.s32.totalorder %v215_v14, %v254_v33 }
  0x49   : > { %vm266_vm2 = vmor %vm246_vm15, %vm260_vm14  ;;  %vm230_vm14 = vcmp.eq.s32.totalorder %v216_v34, %v224_v26  ;;  %vm244_vm15 = vcmp.eq.s32.totalorder %v216_v34, %v238_v29 }
  0x4a   : > { %vm268_vm5 = vmor %vm248_vm1, %vm262_vm0  ;;  %vm264_vm1 = vcmp.eq.s32.totalorder %v216_v34, %v258_v30 }
  0x4b   : > { %vm579_vm8 = vmpackc.low %vm268_vm5, %vm266_vm2  ;;  %vm229_vm5 = vcmp.eq.s32.totalorder %v216_v34, %v220_v31 }
  0x4c   : > { %580 = vmatprep.subr.msk.bf16.mxu1 %vm579_vm8, %v751_v35  ;;  %vm245_vm10 = vmor %vm225_vm3, %vm239_vm4  ;;  %vm243_vm8 = vcmp.eq.s32.totalorder %v216_v34, %v234_v32  ;;  %vm289_vm4 = vcmask 1045504  }
  0x4d   : > { %vm247_vm11 = vmor %vm227_vm6, %vm241_vm7  ;;  %vm263_vm6 = vcmp.eq.s32.totalorder %v216_v34, %v254_v33 }
  0x4e   : > { %vm265_vm13 = vmor %vm245_vm10, %vm259_vm9 }
  0x4f   : > { %vm267_vm0 = vmor %vm247_vm11, %vm261_vm12  ;;  %vm285_vm12 = vcmask 179200  }
  0x50   : > { %vm581_vm2 = vmpackc.low %vm267_vm0, %vm265_vm13 }
  0x51   : > { %582 = vmatpush1.bf16.msk.msra.mxu1 %vm581_vm2, %v751_v35  ;;  %vm250_vm3 = vmor %vm230_vm14, %vm244_vm15 }
  0x52   : > { %vm270_vm7 = vmor %vm250_vm3, %vm264_vm1 }
  0x53   : > { %v560_v36 = vsel %vm270_vm7, 1.0, %v749_v0  ;;  %vm249_vm9 = vmor %vm229_vm5, %vm243_vm8 }
  0x54   : > { %565 = vmatprep.subr.msk.mxu1 %vm289_vm4, %v560_v36  ;;  %vm269_vm10 = vmor %vm249_vm9, %vm263_vm6 }
  0x55   : > { %v559_v38 = vsel %vm269_vm10, 1.0, %v749_v0 }
  0x56   : > { %566 = vmatpush1.msk.msra.mxu1 %vm289_vm4, %v559_v38 }
  0x57   : > { %567 = vmatmul.mubr.msk.f32.vlgmr.msra.gmra.mrb[0].mxu1 %vm285_vm12, %v284_v37 }
 0x114   : > { %v444_v39 = vpop.f32.mrb[0].mxu0 }
 0x115   : > { %v446_v40 = vpop.f32.mrb[1].mxu0 }
 0x12a   : > { %v362_v41 = vpop.f32.mrb[0].mxu1 }
 0x12b   : > { %v445_v42 = vadd.f32 %v444_v39, %v362_v41  ;;  %v364_v43 = vpop.f32.mrb[1].mxu1 }
 0x12c   : > { %v447_v44 = vadd.f32 %v446_v40, %v364_v43 }
 0x12e   : > { %v451_v45 = vcombine.low %v445_v42, %v447_v44 }
 0x130   : > { %571 = vst.sshfl [vmem:[%s188_s20] sm:$0x33 pattern:$0x76325410] %v451_v45 }
 0x131   : > { %690 = shalt.err (!%p687_p3)
}
 0x132   : > { %s691_s9 = scalar_lea.hbm %s902_s28, 64  ;;  %s695_s23 = scalar_lea.hbm %s949_s3, 128 }
 0x133   : > { %p692_p5 = scmp.ne.s32.totalorder %s902_s28, %s691_s9  ;;  %p696_p9 = scmp.lt.u32.totalorder %s902_s28, %s949_s3 }
 0x134   : > { %p697_p0 = scmp.lt.u32.totalorder %s695_s23, %s691_s9  ;;  %p699_p6 = scmp.lt.u32.totalorder %s691_s9, %s902_s28 }
 0x135   : > { %p693_p7 = pnand %p692_p5, %p957_p11 }
 0x136   : > { %p698_p2 = por %p697_p0, %p696_p9 }
 0x137   : > { %p694_p8 = pneg %p693_p7 }
 0x138   : > { %p700_p12 = por %p699_p6, %p698_p2 }
 0x13a   : > { %p701_p13 = pnand %p700_p12, %p694_p8 }
 0x13c   : > { %704 = shalt.err (!%p701_p13)
}
 0x13d   : > { %597 = dma.vmem_to_hbm [thread:$0]  (%p957_p11), %s904_s22, 64, %s902_s28, %s462_s29  }
 0x13e PF: > { %s488_s7 = sand.u32 1, %s731_s12   ;;  %p958_p4 = scmp.ne.s32.totalorder %s954_s25, 0 }
 0x13f   : > { %p959_p10 = scmp.ge.s32.totalorder %s743_s15, 2  ;;  %s489_s8 = scalar_lea.sflag [#allocation4], %s488_s7 }
 0x141   : > { %p604_p1 = pnand %p959_p10, %p958_p4 }
 0x143   : > { %726 = dma.done.wait (!%p604_p1), %s489_s8, 64  }
 0x144   : > { %728 = vsyncadd (!%p604_p1), %s489_s8, 4294967232  ;;  %p16_p3 = scmp.ge.s32.totalorder %s798_s18, 4   ;;  %s960_s12 = smov %s735_s13 }
 0x145   : > { %s961_s13 = smov %s739_s14  ;;  %s962_s14 = smov %s810_s21 }
 0x146   : > { %s963_s15 = smov %s798_s18  ;;  %18 = sbr.rel (!%p16_p3) target bundleno = 5 (0x5), region = 77 }
 0x14d   :  { %494 = vsyncpa [#allocation3], 1 }
 0x14e   :  { %496 = vsyncpa [#allocation3 + $0x1], 1 }
 0x14f   :  { %497 = vsyncpa [#allocation4], 1 }
 0x150   :  { %499 = vsyncpa [#allocation4 + $0x1], 1 }

</bundles_post_ra>
